<compile_context>
chip_gen: v6e
topology: v6e:2x2x1
jax: 0.10.0
libtpu: 0.0.40
codegen_flags: <defaults>
</compile_context>

<pallas_src>
import math

import jax
import jax.numpy as jnp
from jax.experimental import pallas as pl
from jax.experimental.pallas import tpu as pltpu


def _round_up(x, m):
    return ((x + m - 1) // m) * m


def _generator_bias_kernel(x_ref, w1_ref, b1_ref, w2_ref, b2_ref, out_ref, h_ref):
    """One (batch-tile i, output-tile j) grid step.

    x_ref : (TB, Kp)  bf16  -- same block for all j of a batch tile
    w1_ref: (Kp, Hp)  bf16  -- resident across the whole grid
    b1_ref: (1,  Hp)  f32   -- resident
    w2_ref: (Hp, TN)  bf16  -- per output tile
    b2_ref: (1,  TN)  f32   -- per output tile
    out_ref:(TB, TN)  f32
    h_ref : (TB, Hp)  bf16  VMEM scratch: linear1 activations for batch tile i
    """
    j = pl.program_id(1)

    # linear1 + ReLU once per batch tile; reused for every output tile j.
    @pl.when(j == 0)
    def _():
        h = jnp.dot(x_ref[...], w1_ref[...], preferred_element_type=jnp.float32)
        h = jnp.maximum(h + b1_ref[...], 0.0)        # bias + ReLU in f32
        h_ref[...] = h.astype(h_ref.dtype)

    # bias_up for this output tile.
    o = jnp.dot(h_ref[...], w2_ref[...], preferred_element_type=jnp.float32)
    out_ref[...] = (o + b2_ref[...]).astype(out_ref.dtype)


def simple_generator_bias(x, w1, b1, w2, b2, *, tb_cap=256, tn_cap=512):
    """Fused forward of SimpleGenerator_Bias.

    x : [B, input_dim]
    w1: [input_dim, bottleneck]   (== linear1.weight.T)
    b1: [1, bottleneck]
    w2: [bottleneck, hidden_size] (== bias_up.weight.T)
    b2: [1, hidden_size]
    Returns (None, None, None, out) like the PyTorch module.
    """
    B, K = x.shape
    H = w1.shape[1]
    N = w2.shape[1]
    out_dtype = x.dtype

    # Pad to lane/MXU friendly sizes (exact: padding is zeros).
    Kp = _round_up(K, 128)
    Hp = _round_up(H, 128)
    TB = min(_round_up(B, 8), tb_cap)
    Bp = _round_up(B, TB)
    Np = _round_up(N, 128)
    TN = min(Np, tn_cap)
    Np = _round_up(Np, TN)

    # bf16 MXU inputs, f32 biases / accumulation.
    x_p = jnp.zeros((Bp, Kp), jnp.bfloat16).at[:B, :K].set(x.astype(jnp.bfloat16))
    w1_p = jnp.zeros((Kp, Hp), jnp.bfloat16).at[:K, :H].set(w1.astype(jnp.bfloat16))
    b1_p = jnp.zeros((1, Hp), jnp.float32).at[:, :H].set(b1.astype(jnp.float32))
    w2_p = jnp.zeros((Hp, Np), jnp.bfloat16).at[:H, :N].set(w2.astype(jnp.bfloat16))
    b2_p = jnp.zeros((1, Np), jnp.float32).at[:, :N].set(b2.astype(jnp.float32))

    grid = (Bp // TB, Np // TN)

    flops = 2 * Bp * Kp * Hp + 2 * Bp * Hp * Np
    bytes_accessed = (
        x_p.size * 2 + w1_p.size * 2 + w2_p.size * 2
        + b1_p.size * 4 + b2_p.size * 4 + Bp * Np * 4
    )

    out_p = pl.pallas_call(
        _generator_bias_kernel,
        out_shape=jax.ShapeDtypeStruct((Bp, Np), jnp.float32),
        grid=grid,
        in_specs=[
            pl.BlockSpec((TB, Kp), lambda i, j: (i, 0)),   # x: one DMA per batch tile
            pl.BlockSpec((Kp, Hp), lambda i, j: (0, 0)),   # w1: resident
            pl.BlockSpec((1, Hp), lambda i, j: (0, 0)),    # b1: resident
            pl.BlockSpec((Hp, TN), lambda i, j: (0, j)),   # w2: per output tile
            pl.BlockSpec((1, TN), lambda i, j: (0, j)),    # b2: per output tile
        ],
        out_specs=pl.BlockSpec((TB, TN), lambda i, j: (i, j)),
        scratch_shapes=[pltpu.VMEM((TB, Hp), jnp.bfloat16)],
        compiler_params=pltpu.CompilerParams(
            dimension_semantics=("parallel", "arbitrary"),
            vmem_limit_bytes=32 * 1024 * 1024,
        ),
        cost_estimate=pl.CostEstimate(
            flops=flops, transcendentals=0, bytes_accessed=bytes_accessed),
    )(x_p, w1_p, b1_p, w2_p, b2_p)

    out = out_p[:B, :N].astype(out_dtype)
    return (None, None, None, out)


def init_params(key, input_dim, bottleneck, hidden_size):
    """Parameter init matching the PyTorch module's __init__.

    linear1: default nn.Linear init  -> U(-1/sqrt(fan_in), 1/sqrt(fan_in))
    bias_up: hyperfanin_init_bias    -> weight ~ U(-b, b), b = 0.001*sqrt(3/bottleneck),
                                        bias = 0
    """
    k1, k2, k3 = jax.random.split(key, 3)

    lim1 = 1.0 / math.sqrt(input_dim)
    w1 = jax.random.uniform(k1, (input_dim, bottleneck), jnp.float32, -lim1, lim1)
    b1 = jax.random.uniform(k2, (1, bottleneck), jnp.float32, -lim1, lim1)

    bound = 0.001 * math.sqrt(3.0 / bottleneck)
    w2 = jax.random.uniform(k3, (bottleneck, hidden_size), jnp.float32, -bound, bound)
    b2 = jnp.zeros((1, hidden_size), jnp.float32)

    return w1, b1, w2, b2


if __name__ == "__main__":
    # Small shapes consistent with the module: x [batch, input_dim],
    # bottleneck = config.hypernetwork_bottleneck, hidden_size = target width.
    batch, input_dim, bottleneck, hidden_size = 8, 32, 16, 64

    key = jax.random.PRNGKey(0)
    kx, kp = jax.random.split(key)
    x = jax.random.normal(kx, (batch, input_dim), jnp.float32)
    w1, b1, w2, b2 = init_params(kp, input_dim, bottleneck, hidden_size)

    _, _, _, out = simple_generator_bias(x, w1, b1, w2, b2)
    out = jax.block_until_ready(out)
    assert out.shape == (batch, hidden_size)

    # Reference with identical bf16-input / f32-accumulate numerics.
    xb, w1b, w2b = (a.astype(jnp.bfloat16) for a in (x, w1, w2))
    h_ref = jnp.maximum(
        jnp.dot(xb, w1b, preferred_element_type=jnp.float32) + b1, 0.0)
    ref_bf16 = jnp.dot(
        h_ref.astype(jnp.bfloat16), w2b, preferred_element_type=jnp.float32) + b2
    assert jnp.allclose(out, ref_bf16, atol=1e-5, rtol=1e-3)

    # Loose sanity check against the pure-f32 reference.
    ref_f32 = jnp.maximum(x @ w1 + b1, 0.0) @ w2 + b2
    assert jnp.allclose(out, ref_f32, atol=1e-4, rtol=5e-2)

    print("KERNEL_OK")
</pallas_src>

<mosaic_0001>
module attributes {stable_mosaic.version = 11 : i64} {
  func.func @_generator_bias_kernel(%arg0: i32, %arg1: i32, %arg2: memref<8x128xbf16, #tpu.memory_space<vmem>>, %arg3: memref<128x128xbf16, #tpu.memory_space<vmem>>, %arg4: memref<1x128xf32, #tpu.memory_space<vmem>>, %arg5: memref<128x128xbf16, #tpu.memory_space<vmem>>, %arg6: memref<1x128xf32, #tpu.memory_space<vmem>>, %arg7: memref<8x128xf32, #tpu.memory_space<vmem>>, %arg8: memref<8x128xbf16, #tpu.memory_space<vmem>>) attributes {dimension_semantics = [#tpu.dimension_semantics<parallel>, #tpu.dimension_semantics<arbitrary>], iteration_bounds = array<i64: 1, 1>, scalar_prefetch = 0 : i64, scratch_operands = 1 : i64, tpu.core_type = #tpu.core_type<tc>, window_params = [{transform_indices = @transform_0, window_bounds = array<i64: 8, 128>}, {pipeline_mode = #tpu.pipeline_mode<synchronous>, transform_indices = @transform_1, window_bounds = array<i64: 128, 128>}, {pipeline_mode = #tpu.pipeline_mode<synchronous>, transform_indices = @transform_2, window_bounds = array<i64: 1, 128>}, {transform_indices = @transform_3, window_bounds = array<i64: 128, 128>}, {transform_indices = @transform_4, window_bounds = array<i64: 1, 128>}, {transform_indices = @transform_5, window_bounds = array<i64: 8, 128>}]} {
    %c0_i32 = arith.constant 0 : i32
    %0 = arith.cmpi eq, %arg1, %c0_i32 : i32
    %1 = arith.extui %0 : i1 to i32
    %c0_i32_0 = arith.constant 0 : i32
    %2 = arith.cmpi ne, %1, %c0_i32_0 : i32
    scf.if %2 {
      %c0_8 = arith.constant 0 : index
      %c0_9 = arith.constant 0 : index
      %10 = vector.load %arg2[%c0_8, %c0_9] : memref<8x128xbf16, #tpu.memory_space<vmem>>, vector<8x128xbf16>
      %c0_10 = arith.constant 0 : index
      %c0_11 = arith.constant 0 : index
      %11 = vector.load %arg3[%c0_10, %c0_11] : memref<128x128xbf16, #tpu.memory_space<vmem>>, vector<128x128xbf16>
      %cst_12 = arith.constant dense<0.000000e+00> : vector<8x128xf32>
      %12 = tpu.matmul %10, %11, %cst_12 {dimension_numbers = #tpu.dot_dimension_numbers<[1], [0], [0], [1], [0, 0, 1, 1], [], []>} : vector<8x128xbf16>, vector<128x128xbf16>, vector<8x128xf32> -> vector<8x128xf32>
      %c0_13 = arith.constant 0 : index
      %c0_14 = arith.constant 0 : index
      %13 = vector.load %arg4[%c0_13, %c0_14] : memref<1x128xf32, #tpu.memory_space<vmem>>, vector<1x128xf32>
      %14 = vector.broadcast %13 : vector<1x128xf32> to vector<8x128xf32>
      %15 = arith.addf %12, %14 : vector<8x128xf32>
      %cst_15 = arith.constant 0.000000e+00 : f32
      %16 = vector.broadcast %cst_15 : f32 to vector<8x128xf32>
      %17 = arith.maximumf %15, %16 : vector<8x128xf32>
      %18 = arith.truncf %17 : vector<8x128xf32> to vector<8x128xbf16>
      %c0_16 = arith.constant 0 : index
      %c0_17 = arith.constant 0 : index
      %19 = vector.load %arg8[%c0_16, %c0_17] : memref<8x128xbf16, #tpu.memory_space<vmem>>, vector<8x128xbf16>
      tpu.vector_store %arg8[%c0_16, %c0_17], %18 {strides = array<i32>} : memref<8x128xbf16, #tpu.memory_space<vmem>>, vector<8x128xbf16>,
    } else {
    }
    %c0 = arith.constant 0 : index
    %c0_1 = arith.constant 0 : index
    %3 = vector.load %arg8[%c0, %c0_1] : memref<8x128xbf16, #tpu.memory_space<vmem>>, vector<8x128xbf16>
    %c0_2 = arith.constant 0 : index
    %c0_3 = arith.constant 0 : index
    %4 = vector.load %arg5[%c0_2, %c0_3] : memref<128x128xbf16, #tpu.memory_space<vmem>>, vector<128x128xbf16>
    %cst = arith.constant dense<0.000000e+00> : vector<8x128xf32>
    %5 = tpu.matmul %3, %4, %cst {dimension_numbers = #tpu.dot_dimension_numbers<[1], [0], [0], [1], [0, 0, 1, 1], [], []>} : vector<8x128xbf16>, vector<128x128xbf16>, vector<8x128xf32> -> vector<8x128xf32>
    %c0_4 = arith.constant 0 : index
    %c0_5 = arith.constant 0 : index
    %6 = vector.load %arg6[%c0_4, %c0_5] : memref<1x128xf32, #tpu.memory_space<vmem>>, vector<1x128xf32>
    %7 = vector.broadcast %6 : vector<1x128xf32> to vector<8x128xf32>
    %8 = arith.addf %5, %7 : vector<8x128xf32>
    %c0_6 = arith.constant 0 : index
    %c0_7 = arith.constant 0 : index
    %9 = vector.load %arg7[%c0_6, %c0_7] : memref<8x128xf32, #tpu.memory_space<vmem>>, vector<8x128xf32>
    tpu.vector_store %arg7[%c0_6, %c0_7], %8 {strides = array<i32>} : memref<8x128xf32, #tpu.memory_space<vmem>>, vector<8x128xf32>,
    return
  }
  func.func @transform_0(%arg0: i32, %arg1: i32) -> (i32, i32) {
    %c0_i32 = arith.constant 0 : i32
    %c0_i32_0 = arith.constant 0 : i32
    return %arg0, %c0_i32 : i32, i32
  }
  func.func @transform_1(%arg0: i32, %arg1: i32) -> (i32, i32) {
    %c0_i32 = arith.constant 0 : i32
    %c0_i32_0 = arith.constant 0 : i32
    %c0_i32_1 = arith.constant 0 : i32
    return %c0_i32, %c0_i32_0 : i32, i32
  }
  func.func @transform_2(%arg0: i32, %arg1: i32) -> (i32, i32) {
    %c0_i32 = arith.constant 0 : i32
    %c0_i32_0 = arith.constant 0 : i32
    %c0_i32_1 = arith.constant 0 : i32
    return %c0_i32, %c0_i32_0 : i32, i32
  }
  func.func @transform_3(%arg0: i32, %arg1: i32) -> (i32, i32) {
    %c0_i32 = arith.constant 0 : i32
    %c0_i32_0 = arith.constant 0 : i32
    return %c0_i32, %arg1 : i32, i32
  }
  func.func @transform_4(%arg0: i32, %arg1: i32) -> (i32, i32) {
    %c0_i32 = arith.constant 0 : i32
    %c0_i32_0 = arith.constant 0 : i32
    return %c0_i32, %arg1 : i32, i32
  }
  func.func @transform_5(%arg0: i32, %arg1: i32) -> (i32, i32) {
    %c0_i32 = arith.constant 0 : i32
    return %arg0, %arg1 : i32, i32
  }
}

</mosaic_0001>

<bundles_post_ra>
// kernel: tpu_custom_call.1
= control target key start
LH: loop header
LB: loop body
LE: loop exit
PB: predicated region body
PF: predicated region fallthrough
CT: control target
= control target key end

     0   :  { %10 = vsyncpa [#allocation4], 0  ;;  %s551_s0 = inlined_call_operand.hbm [shape: bf16[8,128], index: 0, kind: input, shape index: {}]   ;;  %s552_s1 = inlined_call_operand.hbm [shape: bf16[128,128], index: 1, kind: input, shape index: {}]   ;;  %s553_s2 = inlined_call_operand.vmem [shape: f32[1,128], index: 2, kind: input, shape index: {}]   ;;  %s554_s3 = inlined_call_operand.hbm [shape: bf16[128,128], index: 3, kind: input, shape index: {}]   ;;  %s555_s4 = inlined_call_operand.vmem [shape: f32[1,128], index: 4, kind: input, shape index: {}]   ;;  %s556_s5 = inlined_call_operand.hbm [shape: f32[8,128], index: 5, kind: output, shape index: {}]  }
   0x1   :  { %11 = vsyncpa [#allocation7], 0 }
   0x2   :  { %12 = vsyncpa [#allocation5], 0  ;;  %s495_s18 = smov [#allocation6]  }
   0x3   :  { %s28_s19 = sshll.u32 %s495_s18, 4  ;;  %s29_s19 = int_to_ptr.vmem [resolvable:$true] %s28_s19 }
   0x4   :  { %s417_s20 = scalar_lea.vmem %s29_s19, 1024  ;;  %p422_p1 = scmp.lt.s32.totalorder %s29_s19, %s29_s19 }
   0x5   :  { %p418_p0 = scmp.ne.s32.totalorder %s29_s19, %s417_s20  ;;  %p423_p2 = scmp.lt.s32.totalorder %s417_s20, %s417_s20 }
   0x7   :  { %p424_p3 = por %p423_p2, %p422_p1 }
   0x9   :  { %p425_p4 = pnand %p424_p3, %p418_p0 }
   0xb   :  { %428 = shalt.err (!%p425_p4)
}
   0xc   :  { %s496_s21 = smov 64   ;;  %s497_s22 = smov 4  }
   0xd   :  { %34 = dma.hbm_to_vmem [thread:$0]  %s552_s1, 1024, %s29_s19, [#allocation7], %s496_s21, %s496_s21, %s497_s22  }
   0xe   :  { %s498_s25 = smov [#allocation3]   ;;  %s499_s27 = smov [#allocation8]  }
   0xf   :  { %s19_s26 = sshll.u32 %s498_s25, 4  ;;  %s42_s28 = sshll.u32 %s499_s27, 4  ;;  %s20_s26 = int_to_ptr.vmem [resolvable:$true] %s19_s26  ;;  %s43_s28 = int_to_ptr.vmem [resolvable:$true] %s42_s28 }
  0x10   :  { %s437_s29 = scalar_lea.vmem %s20_s26, 64  ;;  %p442_p6 = scmp.lt.s32.totalorder %s20_s26, %s20_s26 }
  0x11   :  { %p438_p5 = scmp.ne.s32.totalorder %s20_s26, %s437_s29  ;;  %p443_p7 = scmp.lt.s32.totalorder %s437_s29, %s437_s29 }
  0x13   :  { %p444_p8 = por %p443_p7, %p442_p6 }
  0x15   :  { %p445_p9 = pnand %p444_p8, %p438_p5 }
  0x17   :  { %448 = shalt.err (!%p445_p9)
}
  0x18   :  { %22 = dma.hbm_to_vmem [thread:$0]  %s551_s0, 64, %s20_s26, [#allocation4]  }
  0x19   :  { %s457_s7 = scalar_lea.vmem %s43_s28, 1024  ;;  %p462_p11 = scmp.lt.s32.totalorder %s43_s28, %s43_s28 }
  0x1a   :  { %p458_p10 = scmp.ne.s32.totalorder %s43_s28, %s457_s7  ;;  %p463_p12 = scmp.lt.s32.totalorder %s457_s7, %s457_s7 }
  0x1c   :  { %p464_p13 = por %p463_p12, %p462_p11 }
  0x1e   :  { %p465_p0 = pnand %p464_p13, %p458_p10 }
  0x20   :  { %468 = shalt.err (!%p465_p0)
}
  0x21   :  { %48 = dma.hbm_to_vmem [thread:$0]  %s554_s3, 1024, %s43_s28, [#allocation7], %s496_s21, %s496_s21, %s497_s22  }
  0x22   :  { %489 = dma.done.wait [#allocation4], 64  }
  0x23   :  { %490 = vsyncadd [#allocation4], 4294967232 }
  0x24   :  { %491 = dma.done.wait [#allocation7], 2048  }
  0x25   :  { %492 = vsyncadd [#allocation7], 4294965248  ;;  %v500_v0 = vmov 0.0   ;;  %vm501_vm0 = vmmov 0   ;;  %v393_v1 = vld [vmem:[#allocation6 + $0x38] sm:$0xff]   ;;  %v394_v2 = vld [vmem:[#allocation6 + $0x30] sm:$0xff]  }
  0x26   :  { %345 = vmatprep.subr.bf16.mxu0 %v500_v0  ;;  %361 = vmatprep.mubr.msk.bf16.mxu0 %vm501_vm0, %v500_v0  ;;  %v395_v3 = vld [vmem:[#allocation6 + $0x28] sm:$0xff]   ;;  %v401_v4 = vld [vmem:[#allocation8 + $0x38] sm:$0xff]   ;;  %v396_v5 = vld [vmem:[#allocation6 + $0x20] sm:$0xff]   ;;  %s502_s11 = smov [#allocation9]  }
  0x27   :  { %365 = vmatprep.subr.bf16.mxu1 %v500_v0  ;;  %381 = vmatprep.mubr.msk.bf16.mxu1 %vm501_vm0, %v500_v0  ;;  %v402_v6 = vld [vmem:[#allocation8 + $0x30] sm:$0xff]   ;;  %v397_v7 = vld [vmem:[#allocation6 + $0x18] sm:$0xff]   ;;  %v403_v8 = vld [vmem:[#allocation8 + $0x28] sm:$0xff]   ;;  %s299_s12 = sshll.u32 %s502_s11, 4  ;;  %s300_s12 = int_to_ptr.vmem [resolvable:$true] %s299_s12 }
  0x28   :  { %346 = vmatpush3.bf16.msra.mxu0 %v393_v1  ;;  %366 = vmatpush3.bf16.msra.mxu1 %v401_v4  ;;  %v398_v9 = vld [vmem:[#allocation6 + $0x10] sm:$0xff]   ;;  %v404_v10 = vld [vmem:[#allocation8 + $0x20] sm:$0xff]   ;;  %v399_v11 = vld [vmem:[#allocation6 + $0x8] sm:$0xff]   ;;  %p474_p2 = scmp.lt.s32.totalorder %s300_s12, %s300_s12 }
  0x29   :  { %347 = vmatprep.subr.bf16.mxu0 %v500_v0  ;;  %367 = vmatprep.subr.bf16.mxu1 %v500_v0  ;;  %v400_v12 = vld [vmem:[#allocation6] sm:$0xff]   ;;  %v65_v13 = vld [vmem:[#allocation3] sm:$0xf]  ;;  %v406_v15 = vld [vmem:[#allocation8 + $0x10] sm:$0xff]  }
  0x2a   :  { %v405_v14 = vld [vmem:[#allocation8 + $0x18] sm:$0xff]   ;;  %v407_v16 = vld [vmem:[#allocation8 + $0x8] sm:$0xff]   ;;  %v408_v17 = vld [vmem:[#allocation8] sm:$0xff]  }
  0x2b   :  { %v309_v18 = vld [vmem:[%s553_s2] ss:$0 sm:$0xff]  ;;  %s469_s2 = scalar_lea.vmem %s300_s12, 128 }
  0x2c   :  { %348 = vmatpush3.bf16.msra.mxu0 %v394_v2  ;;  %368 = vmatpush3.bf16.msra.mxu1 %v402_v6  ;;  %v318_v27 = vld [vmem:[%s555_s4] ss:$0 sm:$0xff]  ;;  %p470_p1 = scmp.ne.s32.totalorder %s300_s12, %s469_s2  ;;  %p475_p3 = scmp.lt.s32.totalorder %s469_s2, %s469_s2 }
  0x2d   :  { %349 = vmatprep.subr.bf16.mxu0 %v500_v0  ;;  %369 = vmatprep.subr.bf16.mxu1 %v500_v0 }
  0x2e   :  { %p476_p4 = por %p475_p3, %p474_p2 }
  0x30   :  { %350 = vmatpush3.bf16.msra.mxu0 %v395_v3  ;;  %370 = vmatpush3.bf16.msra.mxu1 %v403_v8  ;;  %p477_p5 = pnand %p476_p4, %p470_p1 }
  0x31   :  { %351 = vmatprep.subr.bf16.mxu0 %v500_v0  ;;  %371 = vmatprep.subr.bf16.mxu1 %v500_v0 }
  0x34   :  { %352 = vmatpush3.bf16.msra.mxu0 %v396_v5  ;;  %372 = vmatpush3.bf16.msra.mxu1 %v404_v10 }
  0x35   :  { %353 = vmatprep.subr.bf16.mxu0 %v500_v0  ;;  %373 = vmatprep.subr.bf16.mxu1 %v500_v0 }
  0x38   :  { %354 = vmatpush3.bf16.msra.mxu0 %v397_v7  ;;  %374 = vmatpush3.bf16.msra.mxu1 %v405_v14 }
  0x39   :  { %355 = vmatprep.subr.bf16.mxu0 %v500_v0  ;;  %375 = vmatprep.subr.bf16.mxu1 %v500_v0 }
  0x3c   :  { %356 = vmatpush3.bf16.msra.mxu0 %v398_v9  ;;  %376 = vmatpush3.bf16.msra.mxu1 %v406_v15 }
  0x3d   :  { %357 = vmatprep.subr.bf16.mxu0 %v500_v0  ;;  %377 = vmatprep.subr.bf16.mxu1 %v500_v0 }
  0x40   :  { %358 = vmatpush3.bf16.msra.mxu0 %v399_v11  ;;  %378 = vmatpush3.bf16.msra.mxu1 %v407_v16 }
  0x41   :  { %359 = vmatprep.subr.bf16.mxu0 %v500_v0  ;;  %379 = vmatprep.subr.bf16.mxu1 %v500_v0 }
  0x44   :  { %360 = vmatpush3.bf16.msra.mxu0 %v400_v12  ;;  %380 = vmatpush3.bf16.msra.mxu1 %v408_v17 }
  0x47   :  { %362 = vmatmul.mubr.bf16.vlgmr.msra.gmra.mxu0 %v65_v13 }
 0x107   :  { %v171_v19 = vpop.f32.mrf.mxu0 }
 0x108   :  { %v172_v20 = vadd.f32 %v309_v18, %v171_v19 }
 0x109   :  { %v363_v21 = vpop.f32.mrf.mxu0 }
 0x10a   :  { %v177_v22 = vmax.f32 %v172_v20, 0.0 }
 0x10b   :  { %v174_v23 = vpop.f32.mrf.mxu0 }
 0x10c   :  { %v178_v24 = vpack.c.bf16 %v177_v22, %v177_v22 }
 0x10d   :  { %v364_v25 = vpop.f32.mrf.mxu0 }
 0x10e   :  { %179 = vst [vmem:[#allocation2] sm:$0xf] %v178_v24 }
 0x115   :  { %v180_v26 = vld [vmem:[#allocation2] sm:$0xf] }
 0x116   :  { %382 = vmatmul.mubr.bf16.vlgmr.msra.gmra.mxu1 %v180_v26 }
 0x1d6   :  { %v286_v28 = vpop.f32.mrf.mxu1 }
 0x1d7   :  { %v287_v29 = vadd.f32 %v318_v27, %v286_v28 }
 0x1d8   :  { %v383_v30 = vpop.f32.mrf.mxu1 }
 0x1d9   :  { %292 = vst [vmem:[#allocation9] sm:$0xff] %v287_v29 }
 0x1da   :  { %v289_v31 = vpop.f32.mrf.mxu1 }
 0x1db   :  { %480 = shalt.err (!%p477_p5)
}
 0x1dc   :  { %302 = dma.vmem_to_hbm [thread:$0]  %s300_s12, 128, %s556_s5, [#allocation5]   ;;  %v384_v32 = vpop.f32.mrf.mxu1 }
 0x1dd   :  { %493 = dma.done.wait [#allocation5], 128  }
 0x1de   :  { %494 = vsyncadd [#allocation5], 4294967168 }
 0x1df   :  { %306 = vsyncpa [#allocation4], 1 }
 0x1e0   :  { %307 = vsyncpa [#allocation7], 1 }
 0x1e1   :  { %308 = vsyncpa [#allocation5], 1 }

</bundles_post_ra>
